<compile_context>
chip_gen: v5e
topology: v5e:2x2
jax: 0.10.0
libtpu: 0.0.40
codegen_flags: <defaults>
</compile_context>

<pallas_src>
import jax
import jax.numpy as jnp
from jax.experimental import pallas as pl
from jax.experimental.pallas import tpu as pltpu

LANES = 128


def _mish_kernel(x_ref, o_ref):
    x = x_ref[...].astype(jnp.float32)
    # u = exp(-|x|) is always in (0, 1]: no overflow for any x.
    u = jnp.exp(-jnp.abs(x))
    pos = x >= 0.0
    # tanh(softplus(x)) = n / d  (d in (1, 5], well conditioned)
    n = jnp.where(pos, 1.0 + 2.0 * u, u * (u + 2.0))
    d = jnp.where(pos, n + 2.0 * u * u, n + 2.0)
    r = pl.reciprocal(d, approx=True)
    # Two Newton-Raphson refinements (pure VPU work) restore ~f32 precision of 1/d.
    r = r * (2.0 - d * r)
    r = r * (2.0 - d * r)
    o_ref[...] = (x * n * r).astype(o_ref.dtype)


def mish(x: jax.Array, *, block_bytes: int = 1 << 20) -> jax.Array:
    """Elementwise Mish; accepts any shape (e.g. NCHW), preserves shape/dtype."""
    orig_shape = x.shape
    orig_dtype = x.dtype
    total = x.size
    itemsize = jnp.dtype(orig_dtype).itemsize

    flat = jnp.ravel(x)

    # Pad only if the flat length is not lane-aligned (rare for NN tensors).
    rem = total % LANES
    padded = total if rem == 0 else total + (LANES - rem)
    if padded != total:
        flat = jnp.pad(flat, (0, padded - total))

    rows = padded // LANES
    x2d = flat.reshape(rows, LANES)

    # Sublane granularity by dtype packing (f32: 8, bf16/f16: 16, int8/fp8: 32).
    sub = {4: 8, 2: 16, 1: 32}.get(itemsize, 8)

    # Target ~block_bytes per block (same byte footprint regardless of dtype).
    tile_rows = max(sub, block_bytes // (LANES * itemsize))

    if rows <= tile_rows:
        # Single block equal to the full array dims — always a legal block shape.
        tr = rows
    else:
        tr = max(sub, (tile_rows // sub) * sub)

    grid = (pl.cdiv(rows, tr),)

    out2d = pl.pallas_call(
        _mish_kernel,
        out_shape=jax.ShapeDtypeStruct((rows, LANES), orig_dtype),
        grid_spec=pltpu.PrefetchScalarGridSpec(
            num_scalar_prefetch=0,
            grid=grid,
            in_specs=[pl.BlockSpec((tr, LANES), lambda i: (i, 0))],
            out_specs=pl.BlockSpec((tr, LANES), lambda i: (i, 0)),
        ),
        compiler_params=pltpu.CompilerParams(
            dimension_semantics=("parallel",),
        ),
    )(x2d)

    out_flat = out2d.reshape(-1)
    if padded != total:
        out_flat = out_flat[:total]
    return out_flat.reshape(orig_shape)


def _mish_ref(x):
    xf = x.astype(jnp.float32)
    sp = jnp.logaddexp(xf, 0.0)  # softplus
    return (xf * jnp.tanh(sp)).astype(x.dtype)


if __name__ == "__main__":
    key = jax.random.PRNGKey(0)
    x = jax.random.normal(key, (2, 4, 16, 16), dtype=jnp.float32)  # NCHW

    y = jax.block_until_ready(mish(x))
    y_ref = _mish_ref(x)
    assert y.shape == x.shape and y.dtype == x.dtype
    assert jnp.allclose(y, y_ref, atol=1e-5, rtol=1e-5), "mismatch vs reference"

    # Stability check at large |x| (exp-overflow regime of the naive formula).
    x_big = x * 10.0
    y_big = jax.block_until_ready(mish(x_big))
    assert jnp.all(jnp.isfinite(y_big))
    assert jnp.allclose(y_big, _mish_ref(x_big), atol=1e-5, rtol=1e-5), (
        "mismatch vs reference (large |x|)"
    )

    print("KERNEL_OK")
</pallas_src>

<mosaic_0001>
module attributes {stable_mosaic.version = 11 : i64} {
  func.func @_mish_kernel(%arg0: i32, %arg1: memref<16x128xf32, #tpu.memory_space<vmem>>, %arg2: memref<16x128xf32, #tpu.memory_space<vmem>>) attributes {dimension_semantics = [#tpu.dimension_semantics<parallel>], iteration_bounds = array<i64: 1>, scalar_prefetch = 0 : i64, scratch_operands = 0 : i64, tpu.core_type = #tpu.core_type<tc>, window_params = [{transform_indices = @transform_0, window_bounds = array<i64: 16, 128>}, {transform_indices = @transform_1, window_bounds = array<i64: 16, 128>}]} {
    %c0 = arith.constant 0 : index
    %c0_0 = arith.constant 0 : index
    %0 = vector.load %arg1[%c0, %c0_0] : memref<16x128xf32, #tpu.memory_space<vmem>>, vector<16x128xf32>
    %1 = math.absf %0 : vector<16x128xf32>
    %cst = arith.constant 0.000000e+00 : f32
    %2 = vector.broadcast %cst : f32 to vector<16x128xf32>
    %3 = arith.subf %2, %1 : vector<16x128xf32>
    %4 = math.exp %3 : vector<16x128xf32>
    %cst_1 = arith.constant 0.000000e+00 : f32
    %5 = vector.broadcast %cst_1 : f32 to vector<16x128xf32>
    %6 = arith.cmpf oge, %0, %5 : vector<16x128xf32>
    %cst_2 = arith.constant 2.000000e+00 : f32
    %7 = vector.broadcast %cst_2 : f32 to vector<16x128xf32>
    %8 = arith.mulf %7, %4 : vector<16x128xf32>
    %cst_3 = arith.constant 1.000000e+00 : f32
    %9 = vector.broadcast %cst_3 : f32 to vector<16x128xf32>
    %10 = arith.addf %9, %8 : vector<16x128xf32>
    %cst_4 = arith.constant 2.000000e+00 : f32
    %11 = vector.broadcast %cst_4 : f32 to vector<16x128xf32>
    %12 = arith.addf %4, %11 : vector<16x128xf32>
    %13 = arith.mulf %4, %12 : vector<16x128xf32>
    %14 = arith.select %6, %10, %13 : vector<16x128xi1>, vector<16x128xf32>
    %cst_5 = arith.constant 2.000000e+00 : f32
    %15 = vector.broadcast %cst_5 : f32 to vector<16x128xf32>
    %16 = arith.mulf %15, %4 : vector<16x128xf32>
    %17 = arith.mulf %16, %4 : vector<16x128xf32>
    %18 = arith.addf %14, %17 : vector<16x128xf32>
    %cst_6 = arith.constant 2.000000e+00 : f32
    %19 = vector.broadcast %cst_6 : f32 to vector<16x128xf32>
    %20 = arith.addf %14, %19 : vector<16x128xf32>
    %21 = arith.select %6, %18, %20 : vector<16x128xi1>, vector<16x128xf32>
    %22 = tpu.reciprocal %21 {approx = true} : vector<16x128xf32> -> vector<16x128xf32>
    %23 = arith.mulf %21, %22 : vector<16x128xf32>
    %cst_7 = arith.constant 2.000000e+00 : f32
    %24 = vector.broadcast %cst_7 : f32 to vector<16x128xf32>
    %25 = arith.subf %24, %23 : vector<16x128xf32>
    %26 = arith.mulf %22, %25 : vector<16x128xf32>
    %27 = arith.mulf %21, %26 : vector<16x128xf32>
    %cst_8 = arith.constant 2.000000e+00 : f32
    %28 = vector.broadcast %cst_8 : f32 to vector<16x128xf32>
    %29 = arith.subf %28, %27 : vector<16x128xf32>
    %30 = arith.mulf %26, %29 : vector<16x128xf32>
    %31 = arith.mulf %0, %14 : vector<16x128xf32>
    %32 = arith.mulf %31, %30 : vector<16x128xf32>
    %c0_9 = arith.constant 0 : index
    %c0_10 = arith.constant 0 : index
    %33 = vector.load %arg2[%c0_9, %c0_10] : memref<16x128xf32, #tpu.memory_space<vmem>>, vector<16x128xf32>
    tpu.vector_store %arg2[%c0_9, %c0_10], %32 {strides = array<i32>} : memref<16x128xf32, #tpu.memory_space<vmem>>, vector<16x128xf32>,
    return
  }
  func.func @transform_0(%arg0: i32) -> (i32, i32) {
    %c0_i32 = arith.constant 0 : i32
    %c0_i32_0 = arith.constant 0 : i32
    return %arg0, %c0_i32 : i32, i32
  }
  func.func @transform_1(%arg0: i32) -> (i32, i32) {
    %c0_i32 = arith.constant 0 : i32
    %c0_i32_0 = arith.constant 0 : i32
    return %arg0, %c0_i32 : i32, i32
  }
}

</mosaic_0001>

<bundles_post_ra>
// kernel: tpu_custom_call.1
= control target key start
LH: loop header
LB: loop body
LE: loop exit
PB: predicated region body
PF: predicated region fallthrough
CT: control target
= control target key end

     0   :  { %6 = vsyncpa [#allocation3], 0  ;;  %s186_s0 = inlined_call_operand.hbm [shape: f32[16,128], index: 0, kind: input, shape index: {}]   ;;  %s187_s1 = inlined_call_operand.hbm [shape: f32[16,128], index: 1, kind: output, shape index: {}]  }
   0x1   :  { %7 = vsyncpa [#allocation4], 0  ;;  %s12_s8 = sshll.u32 %s186_s0, 4  ;;  %s158_s9 = smov [#allocation2]   ;;  %s13_s8 = int_to_ptr.hbm [resolvable:$true] %s12_s8 }
   0x2   :  { %s14_s10 = sshll.u32 %s158_s9, 4  ;;  %s159_s11 = smov 128   ;;  %s15_s10 = int_to_ptr.vmem [resolvable:$true] %s14_s10 }
   0x3   :  { %s160_s12 = smov 8  }
   0x4   :  { %20 = dma.hbm_to_vmem [thread:$0]  %s13_s8, 256, %s15_s10, [#allocation3], %s159_s11, %s159_s11, %s160_s12  }
   0x5   :  { %154 = dma.done.wait [#allocation3], 256  }
   0x6   :  { %155 = vsyncadd [#allocation3], 4294967040  ;;  %v25_v0 = vld [vmem:[#allocation2] sm:$0xff]  ;;  %v26_v1 = vld [vmem:[#allocation2 + $0x8] sm:$0xff]  ;;  %s161_s0 = smov [#allocation5]   ;;  %s81_s16 = sshll.u32 %s187_s1, 4  ;;  %s82_s16 = int_to_ptr.hbm [resolvable:$true] %s81_s16 }
   0x7   :  { %v27_v2 = vand.u32 2147483647, %v25_v0  ;;  %v28_v3 = vand.u32 2147483647, %v26_v1  ;;  %vm35_vm0 = vcmp.ge.f32.partialorder %v25_v0, 0.0  ;;  %vm36_vm1 = vcmp.ge.f32.partialorder %v26_v1, 0.0 }
   0x8   :  { %s79_s13 = sshll.u32 %s161_s0, 4  ;;  %s80_s13 = int_to_ptr.vmem [resolvable:$true] %s79_s13 }
   0x9   :  { %v29_v4 = vsub.f32 0.0, %v27_v2  ;;  %v30_v5 = vsub.f32 0.0, %v28_v3 }
   0xb   :  { %v31_v6 = vmul.f32 1.442695, %v29_v4  ;;  %v33_v7 = vmul.f32 1.442695, %v30_v5 }
   0xd   :  { %98 = vpow2.f32 %v31_v6 }
   0xe   :  { %100 = vpow2.f32 %v33_v7 }
  0x13   :  { %v99_v8 = vpop.eup %98 }
  0x14   :  { %v101_v9 = vpop.eup %100  ;;  %v37_v10 = vmul.f32 2.0, %v99_v8  ;;  %v41_v11 = vadd.f32 2.0, %v99_v8 }
  0x15   :  { %v38_v12 = vmul.f32 2.0, %v101_v9  ;;  %v42_v13 = vadd.f32 2.0, %v101_v9 }
  0x16   :  { %v39_v14 = vadd.f32 1.0, %v37_v10  ;;  %v43_v15 = vmul.f32 %v99_v8, %v41_v11  ;;  %v47_v16 = vmul.f32 %v99_v8, %v37_v10 }
  0x17   :  { %v40_v17 = vadd.f32 1.0, %v38_v12  ;;  %v44_v18 = vmul.f32 %v101_v9, %v42_v13  ;;  %v48_v19 = vmul.f32 %v101_v9, %v38_v12 }
  0x18   :  { %v45_v20 = vsel %vm35_vm0, %v39_v14, %v43_v15 }
  0x19   :  { %v49_v21 = vadd.f32 %v47_v16, %v45_v20  ;;  %v51_v22 = vadd.f32 2.0, %v45_v20  ;;  %v46_v23 = vsel %vm36_vm1, %v40_v17, %v44_v18  ;;  %v69_v39 = vmul.f32 %v45_v20, %v25_v0 }
  0x1a   :  { %v50_v24 = vadd.f32 %v48_v19, %v46_v23  ;;  %v52_v25 = vadd.f32 2.0, %v46_v23  ;;  %v70_v41 = vmul.f32 %v46_v23, %v26_v1 }
  0x1b   :  { %v53_v26 = vsel %vm35_vm0, %v49_v21, %v51_v22 }
  0x1c   :  { %102 = vrcp.f32 %v53_v26  ;;  %v54_v27 = vsel %vm36_vm1, %v50_v24, %v52_v25 }
  0x1d   :  { %104 = vrcp.f32 %v54_v27 }
  0x22   :  { %v103_v28 = vpop.eup %102 }
  0x23   :  { %v105_v29 = vpop.eup %104  ;;  %v57_v30 = vmul.f32 %v103_v28, %v53_v26 }
  0x24   :  { %v58_v31 = vmul.f32 %v105_v29, %v54_v27 }
  0x25   :  { %v59_v32 = vsub.f32 2.0, %v57_v30 }
  0x26   :  { %v60_v33 = vsub.f32 2.0, %v58_v31 }
  0x27   :  { %v61_v34 = vmul.f32 %v103_v28, %v59_v32 }
  0x28   :  { %v62_v35 = vmul.f32 %v105_v29, %v60_v33 }
  0x29   :  { %v63_v36 = vmul.f32 %v61_v34, %v53_v26 }
  0x2a   :  { %v64_v37 = vmul.f32 %v62_v35, %v54_v27 }
  0x2b   :  { %v65_v38 = vsub.f32 2.0, %v63_v36 }
  0x2c   :  { %v66_v40 = vsub.f32 2.0, %v64_v37 }
  0x2d   :  { %v67_v42 = vmul.f32 %v65_v38, %v61_v34 }
  0x2e   :  { %v68_v43 = vmul.f32 %v66_v40, %v62_v35 }
  0x2f   :  { %v71_v44 = vmul.f32 %v69_v39, %v67_v42 }
  0x30   :  { %v72_v45 = vmul.f32 %v70_v41, %v68_v43 }
  0x31   :  { %73 = vst [vmem:[#allocation5] sm:$0xff] %v71_v44 }
  0x32   :  { %74 = vst [vmem:[#allocation5 + $0x8] sm:$0xff] %v72_v45 }
  0x33   :  { %87 = dma.vmem_to_hbm [thread:$0]  %s80_s13, 256, %s82_s16, [#allocation4], %s159_s11, %s159_s11, %s160_s12  }
  0x34   :  { %156 = dma.done.wait [#allocation4], 256  }
  0x35   :  { %157 = vsyncadd [#allocation4], 4294967040 }
  0x36   :  { %92 = vsyncpa [#allocation3], 1 }
  0x37   :  { %93 = vsyncpa [#allocation4], 1 }

</bundles_post_ra>
